<compile_context>
chip_gen: v6e
topology: v6e:2x2x1
jax: 0.10.0
libtpu: 0.0.40
codegen_flags: <defaults>
</compile_context>

<pallas_src>
import jax
import jax.numpy as jnp
from jax.experimental import pallas as pl
from jax.experimental.pallas import tpu as pltpu


def _select_joints_kernel(jm_ref, x_ref, o_ref):
    # jm_ref: SMEM (K,) int32 scalar-prefetch ref (the joint map).
    # x_ref:  VMEM (bt, J, D) block of joints for this batch tile.
    # o_ref:  VMEM (bt, K, D) output block.
    # K is static, so this Python loop fully unrolls; each step is a dynamic
    # sublane-slice load + static sublane-slice store entirely inside VMEM.
    K = o_ref.shape[1]
    for k in range(K):
        o_ref[:, pl.ds(k, 1), :] = x_ref[:, pl.ds(jm_ref[k], 1), :]


def joint_mapper(joints, joint_maps=None, *, batch_tile=None):
    """Pallas equivalent of JointMapper.forward.

    joints:     (B, J, D) float array
    joint_maps: optional 1-D int array of length K with values in [0, J)
    returns:    (B, K, D) = joints[:, joint_maps, :]   (or joints if maps is None)
    """
    if joint_maps is None:
        return joints

    joint_maps = jnp.asarray(joint_maps, dtype=jnp.int32)  # torch.long -> int32 for SMEM
    B, J, D = joints.shape
    K = int(joint_maps.shape[0])

    # torch.index_select errors on out-of-range indices; Pallas has no in-kernel
    # bounds check, so clamp to avoid silent OOB VMEM reads.
    joint_maps = jnp.clip(joint_maps, 0, J - 1)

    itemsize = jnp.dtype(joints.dtype).itemsize

    # Pick a batch tile so a single (input + output) block pair stays <= ~4 MiB;
    # with 2-deep double buffering that is <= ~8 MiB resident, inside the default
    # scoped-VMEM limit of every generation (v5e 16 MiB, v6e/v7x 32 MiB).
    if batch_tile is None:
        budget = 4 * 1024 * 1024
        per_row = max((J + K) * D * itemsize, 1)
        bt = max(1, min(B, budget // per_row))
        while B % bt != 0:  # keep every block full (last-two dims are full extents anyway)
            bt -= 1
    else:
        bt = batch_tile

    grid = (B // bt,)

    grid_spec = pltpu.PrefetchScalarGridSpec(
        num_scalar_prefetch=1,  # joint_maps lands in SMEM, readable inside the kernel
        grid=grid,
        in_specs=[
            # Full (J, D) extents in the last two dims -> satisfies (8,128) rule;
            # only the leading batch dim is tiled.
            pl.BlockSpec((bt, J, D), lambda b, jm: (b, 0, 0)),
        ],
        out_specs=pl.BlockSpec((bt, K, D), lambda b, jm: (b, 0, 0)),
    )

    cost = pl.CostEstimate(
        flops=0,
        transcendentals=0,
        bytes_accessed=int(itemsize * (B * J * D + B * K * D)),
    )

    return pl.pallas_call(
        _select_joints_kernel,
        grid_spec=grid_spec,
        out_shape=jax.ShapeDtypeStruct((B, K, D), joints.dtype),
        compiler_params=pltpu.CompilerParams(
            # Batch tiles are fully independent -> lets v7x shard across both TCs.
            dimension_semantics=("parallel",)),
        cost_estimate=cost,
    )(joint_maps, joints)


if __name__ == "__main__":
    key = jax.random.PRNGKey(0)

    B, J, D = 2, 16, 3          # batch, number of joints, xyz
    joints = jax.random.normal(key, (B, J, D), dtype=jnp.float32)

    # Deterministic joint map (a selection/permutation of the J joints).
    joint_maps = jnp.array([5, 2, 7, 0, 11, 3, 9, 14], dtype=jnp.int32)

    # Case 1: joint_maps provided -> gather along axis 1.
    out = jax.block_until_ready(joint_mapper(joints, joint_maps))
    ref = jnp.take(joints, joint_maps, axis=1)
    assert out.shape == (B, joint_maps.shape[0], D)
    assert out.dtype == joints.dtype
    assert bool(jnp.array_equal(out, ref))

    # Case 2: joint_maps is None -> identity (pure passthrough, no kernel needed).
    out_none = jax.block_until_ready(joint_mapper(joints, None))
    assert bool(jnp.array_equal(out_none, joints))

    print("KERNEL_OK")
</pallas_src>

<mosaic_0001>
module attributes {stable_mosaic.version = 11 : i64} {
  func.func @_select_joints_kernel(%arg0: i32, %arg1: memref<8xi32, #tpu.memory_space<smem>>, %arg2: memref<2x16x3xf32, #tpu.memory_space<vmem>>, %arg3: memref<2x8x3xf32, #tpu.memory_space<vmem>>) attributes {dimension_semantics = [#tpu.dimension_semantics<parallel>], iteration_bounds = array<i64: 1>, scalar_prefetch = 1 : i64, scratch_operands = 0 : i64, tpu.core_type = #tpu.core_type<tc>, window_params = [{transform_indices = @transform_0, window_bounds = array<i64: 2, 16, 3>}, {transform_indices = @transform_1, window_bounds = array<i64: 2, 8, 3>}]} {
    %c0 = arith.constant 0 : index
    %0 = memref.load %arg1[%c0] : memref<8xi32, #tpu.memory_space<smem>>
    %c0_0 = arith.constant 0 : index
    %1 = arith.index_cast %0 : i32 to index
    %c0_1 = arith.constant 0 : index
    %2 = vector.load %arg2[%c0_0, %1, %c0_1] : memref<2x16x3xf32, #tpu.memory_space<vmem>>, vector<2x1x3xf32>
    %c0_2 = arith.constant 0 : index
    %c0_3 = arith.constant 0 : index
    %c0_4 = arith.constant 0 : index
    %3 = vector.load %arg3[%c0_2, %c0_3, %c0_4] : memref<2x8x3xf32, #tpu.memory_space<vmem>>, vector<2x1x3xf32>
    tpu.vector_store %arg3[%c0_2, %c0_3, %c0_4], %2 {strides = array<i32>} : memref<2x8x3xf32, #tpu.memory_space<vmem>>, vector<2x1x3xf32>,
    %c1 = arith.constant 1 : index
    %4 = memref.load %arg1[%c1] : memref<8xi32, #tpu.memory_space<smem>>
    %c0_5 = arith.constant 0 : index
    %5 = arith.index_cast %4 : i32 to index
    %c0_6 = arith.constant 0 : index
    %6 = vector.load %arg2[%c0_5, %5, %c0_6] : memref<2x16x3xf32, #tpu.memory_space<vmem>>, vector<2x1x3xf32>
    %c0_7 = arith.constant 0 : index
    %c1_8 = arith.constant 1 : index
    %c0_9 = arith.constant 0 : index
    %7 = vector.load %arg3[%c0_7, %c1_8, %c0_9] : memref<2x8x3xf32, #tpu.memory_space<vmem>>, vector<2x1x3xf32>
    tpu.vector_store %arg3[%c0_7, %c1_8, %c0_9], %6 {strides = array<i32>} : memref<2x8x3xf32, #tpu.memory_space<vmem>>, vector<2x1x3xf32>,
    %c2 = arith.constant 2 : index
    %8 = memref.load %arg1[%c2] : memref<8xi32, #tpu.memory_space<smem>>
    %c0_10 = arith.constant 0 : index
    %9 = arith.index_cast %8 : i32 to index
    %c0_11 = arith.constant 0 : index
    %10 = vector.load %arg2[%c0_10, %9, %c0_11] : memref<2x16x3xf32, #tpu.memory_space<vmem>>, vector<2x1x3xf32>
    %c0_12 = arith.constant 0 : index
    %c2_13 = arith.constant 2 : index
    %c0_14 = arith.constant 0 : index
    %11 = vector.load %arg3[%c0_12, %c2_13, %c0_14] : memref<2x8x3xf32, #tpu.memory_space<vmem>>, vector<2x1x3xf32>
    tpu.vector_store %arg3[%c0_12, %c2_13, %c0_14], %10 {strides = array<i32>} : memref<2x8x3xf32, #tpu.memory_space<vmem>>, vector<2x1x3xf32>,
    %c3 = arith.constant 3 : index
    %12 = memref.load %arg1[%c3] : memref<8xi32, #tpu.memory_space<smem>>
    %c0_15 = arith.constant 0 : index
    %13 = arith.index_cast %12 : i32 to index
    %c0_16 = arith.constant 0 : index
    %14 = vector.load %arg2[%c0_15, %13, %c0_16] : memref<2x16x3xf32, #tpu.memory_space<vmem>>, vector<2x1x3xf32>
    %c0_17 = arith.constant 0 : index
    %c3_18 = arith.constant 3 : index
    %c0_19 = arith.constant 0 : index
    %15 = vector.load %arg3[%c0_17, %c3_18, %c0_19] : memref<2x8x3xf32, #tpu.memory_space<vmem>>, vector<2x1x3xf32>
    tpu.vector_store %arg3[%c0_17, %c3_18, %c0_19], %14 {strides = array<i32>} : memref<2x8x3xf32, #tpu.memory_space<vmem>>, vector<2x1x3xf32>,
    %c4 = arith.constant 4 : index
    %16 = memref.load %arg1[%c4] : memref<8xi32, #tpu.memory_space<smem>>
    %c0_20 = arith.constant 0 : index
    %17 = arith.index_cast %16 : i32 to index
    %c0_21 = arith.constant 0 : index
    %18 = vector.load %arg2[%c0_20, %17, %c0_21] : memref<2x16x3xf32, #tpu.memory_space<vmem>>, vector<2x1x3xf32>
    %c0_22 = arith.constant 0 : index
    %c4_23 = arith.constant 4 : index
    %c0_24 = arith.constant 0 : index
    %19 = vector.load %arg3[%c0_22, %c4_23, %c0_24] : memref<2x8x3xf32, #tpu.memory_space<vmem>>, vector<2x1x3xf32>
    tpu.vector_store %arg3[%c0_22, %c4_23, %c0_24], %18 {strides = array<i32>} : memref<2x8x3xf32, #tpu.memory_space<vmem>>, vector<2x1x3xf32>,
    %c5 = arith.constant 5 : index
    %20 = memref.load %arg1[%c5] : memref<8xi32, #tpu.memory_space<smem>>
    %c0_25 = arith.constant 0 : index
    %21 = arith.index_cast %20 : i32 to index
    %c0_26 = arith.constant 0 : index
    %22 = vector.load %arg2[%c0_25, %21, %c0_26] : memref<2x16x3xf32, #tpu.memory_space<vmem>>, vector<2x1x3xf32>
    %c0_27 = arith.constant 0 : index
    %c5_28 = arith.constant 5 : index
    %c0_29 = arith.constant 0 : index
    %23 = vector.load %arg3[%c0_27, %c5_28, %c0_29] : memref<2x8x3xf32, #tpu.memory_space<vmem>>, vector<2x1x3xf32>
    tpu.vector_store %arg3[%c0_27, %c5_28, %c0_29], %22 {strides = array<i32>} : memref<2x8x3xf32, #tpu.memory_space<vmem>>, vector<2x1x3xf32>,
    %c6 = arith.constant 6 : index
    %24 = memref.load %arg1[%c6] : memref<8xi32, #tpu.memory_space<smem>>
    %c0_30 = arith.constant 0 : index
    %25 = arith.index_cast %24 : i32 to index
    %c0_31 = arith.constant 0 : index
    %26 = vector.load %arg2[%c0_30, %25, %c0_31] : memref<2x16x3xf32, #tpu.memory_space<vmem>>, vector<2x1x3xf32>
    %c0_32 = arith.constant 0 : index
    %c6_33 = arith.constant 6 : index
    %c0_34 = arith.constant 0 : index
    %27 = vector.load %arg3[%c0_32, %c6_33, %c0_34] : memref<2x8x3xf32, #tpu.memory_space<vmem>>, vector<2x1x3xf32>
    tpu.vector_store %arg3[%c0_32, %c6_33, %c0_34], %26 {strides = array<i32>} : memref<2x8x3xf32, #tpu.memory_space<vmem>>, vector<2x1x3xf32>,
    %c7 = arith.constant 7 : index
    %28 = memref.load %arg1[%c7] : memref<8xi32, #tpu.memory_space<smem>>
    %c0_35 = arith.constant 0 : index
    %29 = arith.index_cast %28 : i32 to index
    %c0_36 = arith.constant 0 : index
    %30 = vector.load %arg2[%c0_35, %29, %c0_36] : memref<2x16x3xf32, #tpu.memory_space<vmem>>, vector<2x1x3xf32>
    %c0_37 = arith.constant 0 : index
    %c7_38 = arith.constant 7 : index
    %c0_39 = arith.constant 0 : index
    %31 = vector.load %arg3[%c0_37, %c7_38, %c0_39] : memref<2x8x3xf32, #tpu.memory_space<vmem>>, vector<2x1x3xf32>
    tpu.vector_store %arg3[%c0_37, %c7_38, %c0_39], %30 {strides = array<i32>} : memref<2x8x3xf32, #tpu.memory_space<vmem>>, vector<2x1x3xf32>,
    return
  }
  func.func @transform_0(%arg0: i32, %arg1: memref<8xi32, #tpu.memory_space<smem>>) -> (i32, i32, i32) {
    %c0_i32 = arith.constant 0 : i32
    %c0_i32_0 = arith.constant 0 : i32
    %c0_i32_1 = arith.constant 0 : i32
    return %arg0, %c0_i32, %c0_i32_0 : i32, i32, i32
  }
  func.func @transform_1(%arg0: i32, %arg1: memref<8xi32, #tpu.memory_space<smem>>) -> (i32, i32, i32) {
    %c0_i32 = arith.constant 0 : i32
    %c0_i32_0 = arith.constant 0 : i32
    %c0_i32_1 = arith.constant 0 : i32
    return %arg0, %c0_i32, %c0_i32_0 : i32, i32, i32
  }
}

</mosaic_0001>

<bundles_post_ra>
// kernel: tpu_custom_call.1
= control target key start
LH: loop header
LB: loop body
LE: loop exit
PB: predicated region body
PF: predicated region fallthrough
CT: control target
= control target key end

     0   :  { %s211_s0 = inlined_call_operand.vmem [shape: s32[8], index: 0, kind: input, shape index: {}]   ;;  %s212_s1 = inlined_call_operand.vmem [shape: f32[2,16,3], index: 1, kind: input, shape index: {}]   ;;  %s213_s2 = inlined_call_operand.vmem [shape: f32[2,8,3], index: 2, kind: output, shape index: {}]  }
   0x1   :  { %s7_s11 = sshll.u32 %s211_s0, 4  ;;  %s8_s11 = int_to_ptr.vmem [resolvable:$true] %s7_s11 }
   0x2   :  { %s84_s12 = scalar_lea.vmem %s8_s11, 16  ;;  %p89_p1 = scmp.lt.s32.totalorder %s8_s11, %s8_s11 }
   0x3   :  { %p85_p0 = scmp.ne.s32.totalorder %s8_s11, %s84_s12  ;;  %p90_p2 = scmp.lt.s32.totalorder %s84_s12, %s84_s12 }
   0x5   :  { %p91_p3 = por %p90_p2, %p89_p1 }
   0x7   :  { %p92_p4 = pnand %p91_p3, %p85_p0 }
   0x9   :  { %95 = shalt.err (!%p92_p4)  }
   0xa   :  { %s98_s13 = smov [#allocation3]  }
   0xb   :  { %10 = dma.vmem_to_smem %s8_s11, 16, %s98_s13, [#allocation2] }
   0xc   :  { %96 = dma.done.wait [#allocation2], 16 }
   0xd   :  { %97 = vsyncadd [#allocation2], 4294967280 }
   0xe   :  { %12 = sfence }
   0xf   :  { %s15_s14 = sld [smem:[#allocation3]]  ;;  %vm19_vm0 = vcmask 16384  }
  0x10   :  { %s76_s15 = sld [smem:[#allocation3 + $0x1]] }
  0x11   :  { %s77_s16 = sld [smem:[#allocation3 + $0x2]] }
  0x12   :  { %s78_s17 = sld [smem:[#allocation3 + $0x3]] }
  0x13   :  { %s79_s18 = sld [smem:[#allocation3 + $0x4]] }
  0x14   :  { %s80_s0 = sld [smem:[#allocation3 + $0x5]] }
  0x15   :  { %s16_s21 = scalar_lea.vmem %s212_s1, %s15_s14  ;;  %s120_s22 = sld [smem:[#allocation3 + $0x6]] }
  0x16   :  { %v17_v0 = vld [vmem:[%s16_s21] sm:$0x1]  ;;  %v18_v1 = vld [vmem:[%s16_s21 + $0x10] sm:$0x1]  ;;  %s23_s25 = scalar_lea.vmem %s212_s1, %s76_s15  ;;  %s125_s26 = sld [smem:[#allocation3 + $0x7]] }
  0x17   :  { %20 = vst.msk [vmem:[%s213_s2] sm:$0x1] %vm19_vm0, %v17_v0  ;;  %21 = vst.msk [vmem:[%s213_s2 + $0x8] sm:$0x1] %vm19_vm0, %v18_v1  ;;  %v24_v2 = vld [vmem:[%s23_s25] sm:$0x1]  ;;  %s29_s5 = scalar_lea.vmem %s212_s1, %s77_s16 }
  0x18   :  { %v25_v3 = vld [vmem:[%s23_s25 + $0x10] sm:$0x1]  ;;  %26 = vst.msk [vmem:[%s213_s2 + $0x1] sm:$0x1] %vm19_vm0, %v24_v2  ;;  %v30_v4 = vld [vmem:[%s29_s5] sm:$0x1]  ;;  %s35_s12 = scalar_lea.vmem %s212_s1, %s78_s17 }
  0x19   :  { %27 = vst.msk [vmem:[%s213_s2 + $0x9] sm:$0x1] %vm19_vm0, %v25_v3  ;;  %v31_v5 = vld [vmem:[%s29_s5 + $0x10] sm:$0x1]  ;;  %32 = vst.msk [vmem:[%s213_s2 + $0x2] sm:$0x1] %vm19_vm0, %v30_v4  ;;  %s41_s21 = scalar_lea.vmem %s212_s1, %s79_s18 }
  0x1a   :  { %33 = vst.msk [vmem:[%s213_s2 + $0xa] sm:$0x1] %vm19_vm0, %v31_v5  ;;  %v36_v6 = vld [vmem:[%s35_s12] sm:$0x1]  ;;  %v37_v7 = vld [vmem:[%s35_s12 + $0x10] sm:$0x1]  ;;  %s47_s29 = scalar_lea.vmem %s212_s1, %s80_s0 }
  0x1b   :  { %38 = vst.msk [vmem:[%s213_s2 + $0x3] sm:$0x1] %vm19_vm0, %v36_v6  ;;  %39 = vst.msk [vmem:[%s213_s2 + $0xb] sm:$0x1] %vm19_vm0, %v37_v7  ;;  %v42_v8 = vld [vmem:[%s41_s21] sm:$0x1]  ;;  %s53_s7 = scalar_lea.vmem %s212_s1, %s120_s22 }
  0x1c   :  { %v43_v9 = vld [vmem:[%s41_s21 + $0x10] sm:$0x1]  ;;  %44 = vst.msk [vmem:[%s213_s2 + $0x4] sm:$0x1] %vm19_vm0, %v42_v8  ;;  %v48_v10 = vld [vmem:[%s47_s29] sm:$0x1]  ;;  %s59_s13 = scalar_lea.vmem %s212_s1, %s125_s26 }
  0x1d   :  { %45 = vst.msk [vmem:[%s213_s2 + $0xc] sm:$0x1] %vm19_vm0, %v43_v9  ;;  %v49_v11 = vld [vmem:[%s47_s29 + $0x10] sm:$0x1]  ;;  %50 = vst.msk [vmem:[%s213_s2 + $0x5] sm:$0x1] %vm19_vm0, %v48_v10 }
  0x1e   :  { %51 = vst.msk [vmem:[%s213_s2 + $0xd] sm:$0x1] %vm19_vm0, %v49_v11  ;;  %v54_v12 = vld [vmem:[%s53_s7] sm:$0x1]  ;;  %v55_v13 = vld [vmem:[%s53_s7 + $0x10] sm:$0x1] }
  0x1f   :  { %56 = vst.msk [vmem:[%s213_s2 + $0x6] sm:$0x1] %vm19_vm0, %v54_v12  ;;  %57 = vst.msk [vmem:[%s213_s2 + $0xe] sm:$0x1] %vm19_vm0, %v55_v13  ;;  %v60_v14 = vld [vmem:[%s59_s13] sm:$0x1] }
  0x20   :  { %v61_v15 = vld [vmem:[%s59_s13 + $0x10] sm:$0x1]  ;;  %62 = vst.msk [vmem:[%s213_s2 + $0x7] sm:$0x1] %vm19_vm0, %v60_v14 }
  0x21   :  { %63 = vst.msk [vmem:[%s213_s2 + $0xf] sm:$0x1] %vm19_vm0, %v61_v15 }

</bundles_post_ra>
